<compile_context>
chip_gen: v6e
topology: v6e:2x2x1
jax: 0.10.0
libtpu: 0.0.40
codegen_flags: <defaults>
</compile_context>

<pallas_src>
import functools

import jax
import jax.numpy as jnp
from jax import lax
from jax.experimental import pallas as pl
from jax.experimental.pallas import tpu as pltpu

_SUBLANE = 8
_LANE = 128
_X_BUDGET_BYTES = 6 * 1024 * 1024      # per x block (Pallas double-buffers it)
_DOT_OUT_BYTES = 128 * 1024            # target size of one MXU output temp

_COMPILER_PARAMS_3D = pltpu.CompilerParams(
    dimension_semantics=("parallel", "parallel", "arbitrary"),
    vmem_limit_bytes=48 * 1024 * 1024,
)
_COMPILER_PARAMS_2D = pltpu.CompilerParams(
    dimension_semantics=("parallel", "arbitrary"),
    vmem_limit_bytes=48 * 1024 * 1024,
)


def _round_up(n, m):
    return ((n + m - 1) // m) * m


def _linear_tiles(L, d_in, tdo, itemsize, tb):
    """Returns (tl, cl, cb): L rows per grid step, L rows per dot, batch rows per dot."""
    l8 = _round_up(max(int(L), 1), _SUBLANE)
    # rows per MXU call so the (rows, tdo) f32 result stays ~vreg-file sized
    rows_per_dot = max(_SUBLANE,
                       min(256, (_DOT_OUT_BYTES // (tdo * 4)) // _SUBLANE * _SUBLANE))
    cl = min(l8, rows_per_dot)                       # multiple of 8
    cb = 1                                           # batch rows fused per dot
    while tb % (cb * 2) == 0 and cb * 2 * cl <= rows_per_dot:
        cb *= 2
    # L rows per grid step: multiple of cl, sized by the x-block VMEM budget
    max_rows = max(cl, (_X_BUDGET_BYTES // (tb * d_in * itemsize)) // cl * cl)
    tl = min(_round_up(l8, cl), max_rows)
    return tl, cl, cb


def _pool_tiles(L, d, itemsize, tb):
    l8 = _round_up(max(int(L), 1), _SUBLANE)
    cl = min(l8, 128)
    max_rows = max(cl, (_X_BUDGET_BYTES // (tb * d * itemsize)) // cl * cl)
    tl = min(_round_up(l8, cl), max_rows)
    return tl, cl


# ---------------------------------------------------------------------------
# Kernels
# ---------------------------------------------------------------------------

def _linear_maxpool_kernel(x_ref, w_ref, b_ref, o_ref, *scratch,
                           tb, tl, cl, cb, l_real, mask_tail):
    """out = relu(max_l(x @ W) + b); running max over the L grid axis."""
    # Accumulate straight into the resident output block when it is f32;
    # otherwise use the f32 scratch and cast once at the end.
    acc_ref = scratch[0] if scratch else o_ref
    li = pl.program_id(2)
    nl = pl.num_programs(2)
    d_in = x_ref.shape[-1]
    tdo = w_ref.shape[-1]

    @pl.when(li == 0)
    def _init():
        acc_ref[...] = jnp.full(acc_ref.shape, -jnp.inf, acc_ref.dtype)

    def step(apply_mask):
        w = w_ref[...]                                         # (d_in, tdo), resident
        for rb in range(0, tb, cb):                            # static unroll
            for c0 in range(0, tl, cl):                        # static unroll
                xc = x_ref[pl.ds(rb, cb), pl.ds(c0, cl), :]    # (cb, cl, d_in)
                h = lax.dot_general(                           # MXU, f32 accumulation
                    xc.reshape(cb * cl, d_in), w,
                    dimension_numbers=(((1,), (0,)), ((), ())),
                    preferred_element_type=jnp.float32)        # (cb*cl, tdo)
                h3 = h.reshape(cb, cl, tdo)
                if apply_mask:                                 # only last L tile
                    l_pos = (li * tl + c0
                             + lax.broadcasted_iota(jnp.int32, (1, cl, 1), 1))
                    h3 = jnp.where(l_pos < l_real, h3, -jnp.inf)
                cmax = jnp.max(h3, axis=1)                     # (cb, tdo) sublane reduce
                cur = acc_ref[pl.ds(rb, cb), :]
                acc_ref[pl.ds(rb, cb), :] = jnp.maximum(cur, cmax.astype(acc_ref.dtype))

    if mask_tail:
        @pl.when(li == nl - 1)
        def _masked():
            step(True)

        @pl.when(li < nl - 1)
        def _unmasked():
            step(False)
    else:
        step(False)

    @pl.when(li == nl - 1)
    def _finish():
        # max_l relu(h + b) == relu(max_l h + b): bias is a per-column constant
        # and relu is monotone, so bias + relu run once instead of once per L row.
        o_ref[...] = jnp.maximum(
            acc_ref[...].astype(jnp.float32) + b_ref[...], 0.0).astype(o_ref.dtype)


def _maxpool_kernel(x_ref, o_ref, *, tl, cl, l_real, mask_tail):
    """Running max over L in the input dtype (linear=False path)."""
    li = pl.program_id(1)
    nl = pl.num_programs(1)

    @pl.when(li == 0)
    def _init():
        o_ref[...] = jnp.full(o_ref.shape, -jnp.inf, o_ref.dtype)

    def step(apply_mask):
        for c0 in range(0, tl, cl):                            # static unroll
            xc = x_ref[:, pl.ds(c0, cl), :]                    # (tb, cl, D), input dtype
            if apply_mask:                                     # only last L tile
                l_pos = (li * tl + c0
                         + lax.broadcasted_iota(jnp.int32, (1, cl, 1), 1))
                xc = jnp.where(l_pos < l_real, xc, -jnp.inf)
            o_ref[...] = jnp.maximum(o_ref[...], jnp.max(xc, axis=1))

    if mask_tail:
        @pl.when(li == nl - 1)
        def _masked():
            step(True)

        @pl.when(li < nl - 1)
        def _unmasked():
            step(False)
    else:
        step(False)


# ---------------------------------------------------------------------------
# pallas_call wrappers
# ---------------------------------------------------------------------------

def linear_relu_length_maxpool(x, weight, bias, *, tb=_SUBLANE):
    """out[b, :] = max_l relu(x[b, l, :] @ weight + bias)."""
    B, L, d_in = x.shape
    d_out = weight.shape[1]
    out_dtype = x.dtype

    # Only the (tiny, one-time) weight / bias / output are lane-padded;
    # x streams from HBM in its real (B, L, d_in) shape — no host copy of x.
    dpo = _round_up(d_out, _LANE)
    tdo = min(dpo, 512)                      # d_out tile (parallel grid axis)
    ndo = pl.cdiv(dpo, tdo)
    wp = jnp.pad(weight.astype(x.dtype), ((0, 0), (0, dpo - d_out)))
    bpad = jnp.pad(bias.reshape(1, -1).astype(jnp.float32),
                   ((0, 0), (0, dpo - d_out)))

    tl, cl, cb = _linear_tiles(L, d_in, tdo, x.dtype.itemsize, tb)
    nb = pl.cdiv(B, tb)
    nl = pl.cdiv(L, tl)
    mask_tail = (nl * tl) != L

    use_scratch = out_dtype != jnp.float32
    scratch_shapes = [pltpu.VMEM((tb, tdo), jnp.float32)] if use_scratch else []

    kernel = functools.partial(_linear_maxpool_kernel, tb=tb, tl=tl, cl=cl,
                               cb=cb, l_real=L, mask_tail=mask_tail)
    out = pl.pallas_call(
        kernel,
        out_shape=jax.ShapeDtypeStruct((B, dpo), out_dtype),
        grid_spec=pltpu.PrefetchScalarGridSpec(
            num_scalar_prefetch=0,
            grid=(nb, ndo, nl),
            in_specs=[
                # x: real last dim; overhanging edge blocks are masked in-kernel.
                pl.BlockSpec((tb, tl, d_in), lambda bi, doi, li: (bi, li, 0)),
                # W / bias resident across the L axis, tiled over d_out.
                # (For very large layers, pipeline_mode=pl.Buffered(1) on these
                #  constant-index blocks would halve their VMEM footprint.)
                pl.BlockSpec((d_in, tdo), lambda bi, doi, li: (0, doi)),
                pl.BlockSpec((1, tdo), lambda bi, doi, li: (0, doi)),
            ],
            out_specs=pl.BlockSpec((tb, tdo), lambda bi, doi, li: (bi, doi)),
            scratch_shapes=scratch_shapes,
        ),
        compiler_params=_COMPILER_PARAMS_3D,
    )(x, wp, bpad)
    return out[:, :d_out]


def length_maxpool(x, *, tb=_SUBLANE):
    """out[b, :] = max_l x[b, l, :]."""
    B, L, d = x.shape
    tl, cl = _pool_tiles(L, d, x.dtype.itemsize, tb)
    nb = pl.cdiv(B, tb)
    nl = pl.cdiv(L, tl)
    mask_tail = (nl * tl) != L

    kernel = functools.partial(_maxpool_kernel, tl=tl, cl=cl,
                               l_real=L, mask_tail=mask_tail)
    return pl.pallas_call(
        kernel,
        out_shape=jax.ShapeDtypeStruct((B, d), x.dtype),
        grid_spec=pltpu.PrefetchScalarGridSpec(
            num_scalar_prefetch=0,
            grid=(nb, nl),
            in_specs=[pl.BlockSpec((tb, tl, d), lambda bi, li: (bi, li, 0))],
            out_specs=pl.BlockSpec((tb, d), lambda bi, li: (bi, 0)),
        ),
        compiler_params=_COMPILER_PARAMS_2D,
    )(x)


# ---------------------------------------------------------------------------
# Module wrapper
# ---------------------------------------------------------------------------

class LengthMaxPool1D:
    def __init__(self, in_dim, out_dim, linear=False, key=None):
        self.linear = linear
        self.in_dim = in_dim
        self.out_dim = out_dim
        if self.linear:
            if key is None:
                key = jax.random.PRNGKey(0)
            kw, kb = jax.random.split(key)
            bound = 1.0 / (in_dim ** 0.5)       # mimics nn.Linear uniform init
            # weight stored as (in_dim, out_dim) so the kernel does x @ W
            self.weight = jax.random.uniform(
                kw, (in_dim, out_dim), jnp.float32, -bound, bound)
            self.bias = jax.random.uniform(
                kb, (1, out_dim), jnp.float32, -bound, bound)

    def __call__(self, x):
        B, L, D = x.shape
        assert D == self.in_dim
        if self.linear:
            return linear_relu_length_maxpool(x, self.weight, self.bias)
        return length_maxpool(x)


# ---------------------------------------------------------------------------
# Main
# ---------------------------------------------------------------------------

if __name__ == "__main__":
    key = jax.random.PRNGKey(0)
    kx, kp = jax.random.split(key)

    # Uneven L, non-multiple-of-128 dims and B < 8 exercise the overhanging
    # edge blocks, the last-tile -inf mask and the lane-padded W/out slicing.
    B, L, in_dim, out_dim = 2, 10, 32, 48
    x = jax.random.normal(kx, (B, L, in_dim), dtype=jnp.float32)

    # ---- linear=True path (Linear -> ReLU -> max over length) ----
    mod_lin = LengthMaxPool1D(in_dim, out_dim, linear=True, key=kp)
    y_lin = jax.block_until_ready(mod_lin(x))
    ref_lin = jnp.max(
        jnp.maximum(jnp.einsum("bld,de->ble", x, mod_lin.weight) + mod_lin.bias, 0.0),
        axis=1,
    )
    assert y_lin.shape == (B, out_dim)
    assert jnp.allclose(y_lin, ref_lin, atol=1e-4, rtol=1e-4), "linear path mismatch"

    # ---- linear=False path (just max over length) ----
    mod_plain = LengthMaxPool1D(in_dim, out_dim, linear=False)
    y_plain = jax.block_until_ready(mod_plain(x))
    ref_plain = jnp.max(x, axis=1)
    assert y_plain.shape == (B, in_dim)
    assert jnp.allclose(y_plain, ref_plain, atol=1e-6), "maxpool path mismatch"

    print("KERNEL_OK")
</pallas_src>

<mosaic_0001>
module attributes {stable_mosaic.version = 11 : i64} {
  func.func @_linear_maxpool_kernel(%arg0: i32, %arg1: i32, %arg2: i32, %arg3: memref<8x16x32xf32, #tpu.memory_space<vmem>>, %arg4: memref<32x128xf32, #tpu.memory_space<vmem>>, %arg5: memref<1x128xf32, #tpu.memory_space<vmem>>, %arg6: memref<8x128xf32, #tpu.memory_space<vmem>>) attributes {dimension_semantics = [#tpu.dimension_semantics<parallel>, #tpu.dimension_semantics<parallel>, #tpu.dimension_semantics<arbitrary>], iteration_bounds = array<i64: 1, 1, 1>, scalar_prefetch = 0 : i64, scratch_operands = 0 : i64, tpu.core_type = #tpu.core_type<tc>, window_params = [{transform_indices = @transform_0, window_bounds = array<i64: 8, 16, 32>}, {transform_indices = @transform_1, window_bounds = array<i64: 32, 128>}, {transform_indices = @transform_2, window_bounds = array<i64: 1, 128>}, {transform_indices = @transform_3, window_bounds = array<i64: 8, 128>}]} {
    %c0_i32 = arith.constant 0 : i32
    %0 = arith.cmpi eq, %arg2, %c0_i32 : i32
    %1 = arith.extui %0 : i1 to i32
    %c0_i32_0 = arith.constant 0 : i32
    %2 = arith.cmpi ne, %1, %c0_i32_0 : i32
    scf.if %2 {
      %cst = arith.constant 0xFF800000 : f32
      %12 = vector.broadcast %cst : f32 to vector<8x128xf32>
      %c0 = arith.constant 0 : index
      %c0_7 = arith.constant 0 : index
      %13 = vector.load %arg6[%c0, %c0_7] : memref<8x128xf32, #tpu.memory_space<vmem>>, vector<8x128xf32>
      tpu.vector_store %arg6[%c0, %c0_7], %12 {strides = array<i32>} : memref<8x128xf32, #tpu.memory_space<vmem>>, vector<8x128xf32>,
    } else {
    }
    %c0_i32_1 = arith.constant 0 : i32
    %3 = arith.cmpi eq, %arg2, %c0_i32_1 : i32
    %4 = arith.extui %3 : i1 to i32
    %c0_i32_2 = arith.constant 0 : i32
    %5 = arith.cmpi ne, %4, %c0_i32_2 : i32
    scf.if %5 {
      %c0 = arith.constant 0 : index
      %c0_7 = arith.constant 0 : index
      %12 = vector.load %arg4[%c0, %c0_7] : memref<32x128xf32, #tpu.memory_space<vmem>>, vector<32x128xf32>
      %c0_8 = arith.constant 0 : index
      %c0_9 = arith.constant 0 : index
      %c0_10 = arith.constant 0 : index
      %13 = vector.load %arg3[%c0_8, %c0_9, %c0_10] : memref<8x16x32xf32, #tpu.memory_space<vmem>>, vector<8x16x32xf32>
      %14 = vector.shape_cast %13 : vector<8x16x32xf32> to vector<128x32xf32>
      %cst = arith.constant dense<0.000000e+00> : vector<128x128xf32>
      %15 = tpu.matmul %14, %12, %cst {dimension_numbers = #tpu.dot_dimension_numbers<[1], [0], [0], [1], [0, 0, 1, 1], [], []>} : vector<128x32xf32>, vector<32x128xf32>, vector<128x128xf32> -> vector<128x128xf32>
      %16 = vector.shape_cast %15 : vector<128x128xf32> to vector<8x16x128xf32>
      %c16_i32 = arith.constant 16 : i32
      %17 = arith.muli %arg2, %c16_i32 : i32
      %c0_i32_11 = arith.constant 0 : i32
      %18 = arith.addi %17, %c0_i32_11 : i32
      %19 = tpu.iota {dimensions = array<i32: 1>} : vector<1x16x1xi32>
      %20 = vector.broadcast %18 : i32 to vector<1x16x1xi32>
      %21 = arith.addi %20, %19 : vector<1x16x1xi32>
      %c10_i32 = arith.constant 10 : i32
      %22 = vector.broadcast %c10_i32 : i32 to vector<1x16x1xi32>
      %23 = arith.cmpi slt, %21, %22 : vector<1x16x1xi32>
      %cst_12 = arith.constant 0xFF800000 : f32
      %24 = vector.shape_cast %23 : vector<1x16x1xi1> to vector<1x16x1xi1>
      %25 = vector.broadcast %24 : vector<1x16x1xi1> to vector<8x16x128xi1>
      %26 = vector.broadcast %cst_12 : f32 to vector<8x16x128xf32>
      %27 = arith.select %25, %16, %26 : vector<8x16x128xi1>, vector<8x16x128xf32>
      %cst_13 = arith.constant dense<0xFF800000> : vector<8x128xf32>
      %28 = vector.multi_reduction <maximumf>, %27, %cst_13 [1] : vector<8x16x128xf32> to vector<8x128xf32>
      %c0_14 = arith.constant 0 : index
      %c0_15 = arith.constant 0 : index
      %29 = vector.load %arg6[%c0_14, %c0_15] : memref<8x128xf32, #tpu.memory_space<vmem>>, vector<8x128xf32>
      %30 = arith.maximumf %29, %28 : vector<8x128xf32>
      %c0_16 = arith.constant 0 : index
      %c0_17 = arith.constant 0 : index
      %31 = vector.load %arg6[%c0_16, %c0_17] : memref<8x128xf32, #tpu.memory_space<vmem>>, vector<8x128xf32>
      tpu.vector_store %arg6[%c0_16, %c0_17], %30 {strides = array<i32>} : memref<8x128xf32, #tpu.memory_space<vmem>>, vector<8x128xf32>,
    } else {
    }
    %c0_i32_3 = arith.constant 0 : i32
    %6 = arith.cmpi slt, %arg2, %c0_i32_3 : i32
    %7 = arith.extui %6 : i1 to i32
    %c0_i32_4 = arith.constant 0 : i32
    %8 = arith.cmpi ne, %7, %c0_i32_4 : i32
    scf.if %8 {
      %c0 = arith.constant 0 : index
      %c0_7 = arith.constant 0 : index
      %12 = vector.load %arg4[%c0, %c0_7] : memref<32x128xf32, #tpu.memory_space<vmem>>, vector<32x128xf32>
      %c0_8 = arith.constant 0 : index
      %c0_9 = arith.constant 0 : index
      %c0_10 = arith.constant 0 : index
      %13 = vector.load %arg3[%c0_8, %c0_9, %c0_10] : memref<8x16x32xf32, #tpu.memory_space<vmem>>, vector<8x16x32xf32>
      %14 = vector.shape_cast %13 : vector<8x16x32xf32> to vector<128x32xf32>
      %cst = arith.constant dense<0.000000e+00> : vector<128x128xf32>
      %15 = tpu.matmul %14, %12, %cst {dimension_numbers = #tpu.dot_dimension_numbers<[1], [0], [0], [1], [0, 0, 1, 1], [], []>} : vector<128x32xf32>, vector<32x128xf32>, vector<128x128xf32> -> vector<128x128xf32>
      %16 = vector.shape_cast %15 : vector<128x128xf32> to vector<8x16x128xf32>
      %cst_11 = arith.constant dense<0xFF800000> : vector<8x128xf32>
      %17 = vector.multi_reduction <maximumf>, %16, %cst_11 [1] : vector<8x16x128xf32> to vector<8x128xf32>
      %c0_12 = arith.constant 0 : index
      %c0_13 = arith.constant 0 : index
      %18 = vector.load %arg6[%c0_12, %c0_13] : memref<8x128xf32, #tpu.memory_space<vmem>>, vector<8x128xf32>
      %19 = arith.maximumf %18, %17 : vector<8x128xf32>
      %c0_14 = arith.constant 0 : index
      %c0_15 = arith.constant 0 : index
      %20 = vector.load %arg6[%c0_14, %c0_15] : memref<8x128xf32, #tpu.memory_space<vmem>>, vector<8x128xf32>
      tpu.vector_store %arg6[%c0_14, %c0_15], %19 {strides = array<i32>} : memref<8x128xf32, #tpu.memory_space<vmem>>, vector<8x128xf32>,
    } else {
    }
    %c0_i32_5 = arith.constant 0 : i32
    %9 = arith.cmpi eq, %arg2, %c0_i32_5 : i32
    %10 = arith.extui %9 : i1 to i32
    %c0_i32_6 = arith.constant 0 : i32
    %11 = arith.cmpi ne, %10, %c0_i32_6 : i32
    scf.if %11 {
      %c0 = arith.constant 0 : index
      %c0_7 = arith.constant 0 : index
      %12 = vector.load %arg6[%c0, %c0_7] : memref<8x128xf32, #tpu.memory_space<vmem>>, vector<8x128xf32>
      %c0_8 = arith.constant 0 : index
      %c0_9 = arith.constant 0 : index
      %13 = vector.load %arg5[%c0_8, %c0_9] : memref<1x128xf32, #tpu.memory_space<vmem>>, vector<1x128xf32>
      %14 = vector.broadcast %13 : vector<1x128xf32> to vector<8x128xf32>
      %15 = arith.addf %12, %14 : vector<8x128xf32>
      %cst = arith.constant 0.000000e+00 : f32
      %16 = vector.broadcast %cst : f32 to vector<8x128xf32>
      %17 = arith.maximumf %15, %16 : vector<8x128xf32>
      %c0_10 = arith.constant 0 : index
      %c0_11 = arith.constant 0 : index
      %18 = vector.load %arg6[%c0_10, %c0_11] : memref<8x128xf32, #tpu.memory_space<vmem>>, vector<8x128xf32>
      tpu.vector_store %arg6[%c0_10, %c0_11], %17 {strides = array<i32>} : memref<8x128xf32, #tpu.memory_space<vmem>>, vector<8x128xf32>,
    } else {
    }
    return
  }
  func.func @transform_0(%arg0: i32, %arg1: i32, %arg2: i32) -> (i32, i32, i32) {
    %c0_i32 = arith.constant 0 : i32
    %c0_i32_0 = arith.constant 0 : i32
    return %arg0, %arg2, %c0_i32 : i32, i32, i32
  }
  func.func @transform_1(%arg0: i32, %arg1: i32, %arg2: i32) -> (i32, i32) {
    %c0_i32 = arith.constant 0 : i32
    %c0_i32_0 = arith.constant 0 : i32
    return %c0_i32, %arg1 : i32, i32
  }
  func.func @transform_2(%arg0: i32, %arg1: i32, %arg2: i32) -> (i32, i32) {
    %c0_i32 = arith.constant 0 : i32
    %c0_i32_0 = arith.constant 0 : i32
    return %c0_i32, %arg1 : i32, i32
  }
  func.func @transform_3(%arg0: i32, %arg1: i32, %arg2: i32) -> (i32, i32) {
    %c0_i32 = arith.constant 0 : i32
    return %arg0, %arg1 : i32, i32
  }
}

</mosaic_0001>

<bundles_post_ra>
// kernel: tpu_custom_call.1
= control target key start
LH: loop header
LB: loop body
LE: loop exit
PB: predicated region body
PF: predicated region fallthrough
CT: control target
= control target key end

     0   :  { %8 = vsyncpa [#allocation3], 0  ;;  %vm40_vm0 = vcmask 261120   ;;  %v235_v20 = vlaneseq  ;;  %vm328_vm2 = vcmask 1041409   ;;  %vm330_vm3 = vcmask 1042434   ;;  %s907_s0 = inlined_call_operand.vmem [shape: f32[2,10,32], index: 0, kind: input, shape index: {}]   ;;  %s908_s1 = inlined_call_operand.vmem [shape: f32[32,128], index: 1, kind: input, shape index: {}]   ;;  %s909_s2 = inlined_call_operand.vmem [shape: f32[1,128], index: 2, kind: input, shape index: {}]   ;;  %s910_s3 = inlined_call_operand.hbm [shape: f32[2,128], index: 3, kind: output, shape index: {}]  }
   0x1   :  { %v23_v0 = vld [vmem:[%s908_s1 + $0x18] sm:$0xff]  ;;  %v22_v1 = vld [vmem:[%s908_s1 + $0x10] sm:$0xff]  ;;  %v21_v2 = vld [vmem:[%s908_s1 + $0x8] sm:$0xff]  ;;  %vm332_vm4 = vcmask 1043459   ;;  %vm334_vm5 = vcmask 1044484   ;;  %vm336_vm6 = vcmask 1045509  }
   0x2   :  { %728 = vmatprep.subr.mxu0 %v23_v0  ;;  %760 = vmatprep.subr.mxu1 %v23_v0  ;;  %v20_v3 = vld [vmem:[%s908_s1] sm:$0xff]  ;;  %v25_v6 = vld [vmem:[%s907_s0 + $0x8] sm:$0xff]  ;;  %v26_v8 = vld [vmem:[%s907_s0 + $0x10] sm:$0xff]  ;;  %v236_v21 = vshrl.u32 %v235_v20, 7  ;;  %vm338_vm7 = vcmask 1046534   ;;  %vm340_vm8 = vcmask 1047559  }
   0x3   :  { %729 = vmatpush3.msra.mxu0 %v23_v0  ;;  %764 = vmatpush3.msra.mxu1 %v23_v0  ;;  %v24_v4 = vld [vmem:[%s907_s0] sm:$0xff]  ;;  %v33_v7 = vld [vmem:[%s907_s0 + $0x48] sm:$0xff]  ;;  %v34_v9 = vld [vmem:[%s907_s0 + $0x50] sm:$0xff] }
   0x4   :  { %730 = vmatprep.subr.mxu0 %v22_v1  ;;  %761 = vmatprep.subr.mxu1 %v22_v1  ;;  %v32_v5 = vld [vmem:[%s907_s0 + $0x40] sm:$0xff]  ;;  %v27_v10 = vld [vmem:[%s907_s0 + $0x18] sm:$0xff]  ;;  %v29_v14 = vld [vmem:[%s907_s0 + $0x28] sm:$0xff]  ;;  %v237_v22 = vadd.s32 8, %v236_v21 }
   0x5   :  { %731 = vmatpush3.msra.mxu0 %v22_v1  ;;  %765 = vmatpush3.msra.mxu1 %v22_v1  ;;  %v35_v11 = vld [vmem:[%s907_s0 + $0x58] sm:$0xff]  ;;  %v28_v12 = vld [vmem:[%s907_s0 + $0x20] sm:$0xff]  ;;  %v37_v15 = vld [vmem:[%s907_s0 + $0x68] sm:$0xff] }
   0x6   :  { %732 = vmatprep.subr.mxu0 %v21_v2  ;;  %762 = vmatprep.subr.mxu1 %v21_v2  ;;  %v36_v13 = vld [vmem:[%s907_s0 + $0x60] sm:$0xff]  ;;  %v30_v16 = vld [vmem:[%s907_s0 + $0x30] sm:$0xff]  ;;  %v31_v18 = vld [vmem:[%s907_s0 + $0x38] sm:$0xff]  ;;  %vm242_vm1 = vcmp.lt.s32.totalorder %v237_v22, 10 }
   0x7   :  { %733 = vmatpush3.msra.mxu0 %v21_v2  ;;  %766 = vmatpush3.msra.mxu1 %v21_v2  ;;  %v38_v17 = vld [vmem:[%s907_s0 + $0x70] sm:$0xff]  ;;  %v39_v19 = vld [vmem:[%s907_s0 + $0x78] sm:$0xff] }
   0x8   :  { %734 = vmatprep.subr.mxu0 %v20_v3  ;;  %763 = vmatprep.subr.mxu1 %v20_v3 }
   0x9   :  { %735 = vmatpush3.msra.mxu0 %v20_v3  ;;  %767 = vmatpush3.msra.mxu1 %v20_v3 }
   0xa   :  { %736 = vmatprep.mubr.msk.f32.mxu0 %vm40_vm0, %v24_v4  ;;  %748 = vmatprep.mubr.msk.f32.mxu1 %vm40_vm0, %v32_v5 }
   0xb   :  { %737 = vmatmul.mubr.msk.f32.vlgmr.msra.gmra.mxu0 %vm40_vm0, %v25_v6  ;;  %749 = vmatmul.mubr.msk.f32.vlgmr.msra.gmra.mxu1 %vm40_vm0, %v33_v7 }
   0xc   :  { %739 = vmatprep.mubr.msk.f32.mxu0 %vm40_vm0, %v26_v8  ;;  %751 = vmatprep.mubr.msk.f32.mxu1 %vm40_vm0, %v34_v9 }
   0xf   :  { %740 = vmatmul.mubr.msk.f32.gmra.mxu0 %vm40_vm0, %v27_v10  ;;  %752 = vmatmul.mubr.msk.f32.gmra.mxu1 %vm40_vm0, %v35_v11 }
  0x10   :  { %742 = vmatprep.mubr.msk.f32.mxu0 %vm40_vm0, %v28_v12  ;;  %754 = vmatprep.mubr.msk.f32.mxu1 %vm40_vm0, %v36_v13 }
  0x13   :  { %743 = vmatmul.mubr.msk.f32.gmra.mxu0 %vm40_vm0, %v29_v14  ;;  %755 = vmatmul.mubr.msk.f32.gmra.mxu1 %vm40_vm0, %v37_v15 }
  0x14   :  { %745 = vmatprep.mubr.msk.f32.mxu0 %vm40_vm0, %v30_v16  ;;  %757 = vmatprep.mubr.msk.f32.mxu1 %vm40_vm0, %v38_v17 }
  0x17   :  { %746 = vmatmul.mubr.msk.f32.gmra.mxu0 %vm40_vm0, %v31_v18  ;;  %758 = vmatmul.mubr.msk.f32.gmra.mxu1 %vm40_vm0, %v39_v19 }
  0xcb   :  { %v738_v23 = vpop.f32.mrf.mxu0  ;;  %v750_v24 = vpop.f32.mrf.mxu1 }
  0xcc   :  { %v248_v25 = vsel %vm242_vm1, %v738_v23, -inf  ;;  %v256_v26 = vsel %vm242_vm1, %v750_v24, -inf }
  0xcd   :  { %v155_v27 = vpop.f32.mrf.mxu0  ;;  %v195_v28 = vpop.f32.mrf.mxu1 }
  0xce   :  { %v263_v29 = vmax.f32 %v155_v27, %v248_v25  ;;  %v291_v33 = vmax.f32 %v195_v28, %v256_v26 }
  0xcf   :  { %v741_v30 = vpop.f32.mrf.mxu0  ;;  %v753_v31 = vpop.f32.mrf.mxu1 }
  0xd0   :  { %v264_v32 = vrot.slane %v263_v29, 4  ;;  %v250_v34 = vsel %vm242_vm1, %v741_v30, -inf  ;;  %v258_v35 = vsel %vm242_vm1, %v753_v31, -inf  ;;  %v292_v43 = vrot.slane %v291_v33, 4 }
  0xd1   :  { %v165_v36 = vpop.f32.mrf.mxu0  ;;  %v205_v37 = vpop.f32.mrf.mxu1 }
  0xd2   :  { %v270_v38 = vmax.f32 %v165_v36, %v250_v34  ;;  %v298_v39 = vmax.f32 %v205_v37, %v258_v35  ;;  %v265_v42 = vmax.f32 %v263_v29, %v264_v32  ;;  %v293_v56 = vmax.f32 %v291_v33, %v292_v43 }
  0xd3   :  { %v744_v40 = vpop.f32.mrf.mxu0  ;;  %v756_v41 = vpop.f32.mrf.mxu1 }
  0xd4   :  { %v271_v44 = vrot.slane %v270_v38, 4  ;;  %v299_v45 = vrot.slane %v298_v39, 4  ;;  %v252_v46 = vsel %vm242_vm1, %v744_v40, -inf  ;;  %v260_v47 = vsel %vm242_vm1, %v756_v41, -inf }
  0xd5   :  { %v175_v48 = vpop.f32.mrf.mxu0  ;;  %v215_v49 = vpop.f32.mrf.mxu1  ;;  %v266_v55 = vrot.slane %v265_v42, 2  ;;  %v294_v7 = vrot.slane %v293_v56, 2 }
  0xd6   :  { %v272_v50 = vmax.f32 %v270_v38, %v271_v44  ;;  %v277_v51 = vmax.f32 %v175_v48, %v252_v46  ;;  %v305_v52 = vmax.f32 %v215_v49, %v260_v47  ;;  %v300_v58 = vmax.f32 %v298_v39, %v299_v45  ;;  %v707_v46 = vld [vmem:[%s909_s2] ss:$0 sm:$0xff] }
  0xd7   :  { %v747_v53 = vpop.f32.mrf.mxu0  ;;  %v759_v54 = vpop.f32.mrf.mxu1  ;;  %v267_v6 = vmax.f32 %v265_v42, %v266_v55  ;;  %v295_v18 = vmax.f32 %v293_v56, %v294_v7 }
  0xd8   :  { %v273_v57 = vrot.slane %v272_v50, 2  ;;  %v278_v59 = vrot.slane %v277_v51, 4  ;;  %v306_v60 = vrot.slane %v305_v52, 4  ;;  %v254_v61 = vsel %vm242_vm1, %v747_v53, -inf }
  0xd9   :  { %v262_v62 = vsel %vm242_vm1, %v759_v54, -inf  ;;  %v185_v63 = vpop.f32.mrf.mxu0  ;;  %v225_v0 = vpop.f32.mrf.mxu1  ;;  %v301_v8 = vrot.slane %v300_v58, 2  ;;  %v268_v17 = vrot.slane %v267_v6, 1  ;;  %v296_v27 = vrot.slane %v295_v18, 1 }
  0xda   :  { %v274_v1 = vmax.f32 %v272_v50, %v273_v57  ;;  %v279_v2 = vmax.f32 %v277_v51, %v278_v59  ;;  %v307_v3 = vmax.f32 %v305_v52, %v306_v60  ;;  %v284_v4 = vmax.f32 %v185_v63, %v254_v61 }
  0xdb   :  { %v312_v5 = vmax.f32 %v225_v0, %v262_v62  ;;  %v302_v19 = vmax.f32 %v300_v58, %v301_v8  ;;  %v269_v29 = vmax.f32 %v267_v6, %v268_v17  ;;  %v297_v36 = vmax.f32 %v295_v18, %v296_v27 }
  0xdc   :  { %v280_v9 = vrot.slane %v279_v2, 2  ;;  %v285_v10 = vrot.slane %v284_v4, 4  ;;  %v308_v12 = vrot.slane %v307_v3, 2  ;;  %v275_v13 = vrot.slane %v274_v1, 1 }
  0xdd   :  { %v313_v11 = vrot.slane %v312_v5, 4  ;;  %v303_v30 = vrot.slane %v302_v19, 1 }
  0xde   :  { %v281_v14 = vmax.f32 %v279_v2, %v280_v9  ;;  %v286_v15 = vmax.f32 %v284_v4, %v285_v10  ;;  %v309_v23 = vmax.f32 %v307_v3, %v308_v12  ;;  %v276_v24 = vmax.f32 %v274_v1, %v275_v13 }
  0xdf   :  { %v314_v16 = vmax.f32 %v312_v5, %v313_v11  ;;  %v304_v38 = vmax.f32 %v302_v19, %v303_v30 }
  0xe0   :  { %v282_v20 = vrot.slane %v281_v14, 1  ;;  %v287_v21 = vrot.slane %v286_v15, 2  ;;  %v310_v32 = vrot.slane %v309_v23, 1  ;;  %v329_v33 = vsel %vm328_vm2, %v276_v24, %v269_v29 }
  0xe1   :  { %v315_v22 = vrot.slane %v314_v16, 2 }
  0xe2   :  { %v288_v25 = vmax.f32 %v286_v15, %v287_v21  ;;  %v283_v28 = vmax.f32 %v281_v14, %v282_v20  ;;  %v311_v40 = vmax.f32 %v309_v23, %v310_v32 }
  0xe3   :  { %v316_v26 = vmax.f32 %v314_v16, %v315_v22 }
  0xe4   :  { %v289_v31 = vrot.slane %v288_v25, 1  ;;  %v331_v37 = vsel %vm330_vm3, %v283_v28, %v329_v33 }
  0xe5   :  { %v317_v35 = vrot.slane %v316_v26, 1 }
  0xe6   :  { %v290_v34 = vmax.f32 %v288_v25, %v289_v31 }
  0xe7   :  { %v318_v42 = vmax.f32 %v316_v26, %v317_v35 }
  0xe8   :  { %v333_v39 = vsel %vm332_vm4, %v290_v34, %v331_v37 }
  0xe9   :  { %v335_v41 = vsel %vm334_vm5, %v297_v36, %v333_v39 }
  0xea   :  { %v337_v43 = vsel %vm336_vm6, %v304_v38, %v335_v41 }
  0xeb   :  { %v339_v44 = vsel %vm338_vm7, %v311_v40, %v337_v43 }
  0xec   :  { %v341_v45 = vsel %vm340_vm8, %v318_v42, %v339_v44 }
  0xed   :  { %v656_v47 = vadd.f32 %v707_v46, %v341_v45 }
  0xef   :  { %v657_v48 = vmax.f32 %v656_v47, 0.0 }
  0xf1   :  { %658 = vst [vmem:[#allocation2] sm:$0xff] %v657_v48 }
  0xf2   :  { %663 = vsyncadd [#allocation3], 96  ;;  %s794_s25 = smov [#allocation2]  }
  0xf3   :  { %s664_s1 = sshll.u32 %s794_s25, 4  ;;  %s665_s1 = int_to_ptr.vmem [resolvable:$true] %s664_s1 }
  0xf4   :  { %s772_s26 = scalar_lea.vmem %s665_s1, 32  ;;  %s776_s27 = scalar_lea.vmem %s665_s1, 128 }
  0xf5   :  { %p773_p0 = scmp.ne.s32.totalorder %s665_s1, %s772_s26  ;;  %p777_p1 = scmp.lt.s32.totalorder %s665_s1, %s665_s1 }
  0xf6   :  { %p778_p2 = scmp.lt.s32.totalorder %s776_s27, %s772_s26 }
  0xf8   :  { %p779_p3 = por %p778_p2, %p777_p1 }
  0xfa   :  { %p780_p4 = pnand %p779_p3, %p773_p0 }
  0xfc   :  { %783 = shalt.err (!%p780_p4)
}
  0xfd   :  { %s795_s28 = smov 32   ;;  %s796_s29 = smov 2  }
  0xfe   :  { %670 = dma.vmem_to_hbm [thread:$0]  %s665_s1, 32, %s910_s3, [#allocation3], %s795_s28, %s795_s28, %s796_s29  }
  0xff   :  { %792 = dma.done.wait [#allocation3], 128  }
 0x100   :  { %793 = vsyncadd [#allocation3], 4294967168 }
 0x101   :  { %674 = vsyncpa [#allocation3], 1 }

</bundles_post_ra>
